<compile_context>
chip_gen: v6e
topology: v6e:2x2x1
jax: 0.10.0
libtpu: 0.0.40
codegen_flags: <defaults>
</compile_context>

<pallas_src>
import functools

import jax
import jax.numpy as jnp
from jax.experimental import pallas as pl
from jax.experimental.pallas import tpu as pltpu


def _pad_to(n, m):
    return ((n + m - 1) // m) * m


def _activation_dtype():
    """bf16 intermediates on v6e/v7x (bf16 VPU); f32 on v5e (no bf16 VPU)."""
    try:
        kind = jax.devices()[0].device_kind.lower()
    except Exception:
        kind = ""
    return jnp.float32 if "v5" in kind else jnp.bfloat16


def particle_flow_kernel(
    x_ref,
    w1, b1, w2, b2, w3, b3,
    f1, g1, f2, g2, f3, g3,
    wo, bo,
    o_ref,
    *, tb, n_pts, d_in, act_dtype,
):
    """One grid step = TB batch events.

    x_ref : (TB*N_p, D_in8) bf16, mask folded into column d_in.
    phi weights bf16, event-head weights f32, biases f32.
    o_ref : (TB, 128) f32 (lane-dense slab).
    """

    def dense_bf16(a, w_ref, b_ref):
        # bf16 inputs on the MXU, f32 accumulation, f32 bias add on the VPU.
        return jnp.dot(a.astype(jnp.bfloat16), w_ref[...],
                       preferred_element_type=jnp.float32) + b_ref[...]

    def dense_f32(a, w_ref, b_ref):
        return jnp.dot(a, w_ref[...],
                       preferred_element_type=jnp.float32) + b_ref[...]

    x = x_ref[...]                                        # (TB*N, D_in8) bf16
    m = x[:, d_in:d_in + 1].astype(jnp.float32)           # (TB*N, 1) f32 mask

    # per-point MLP: phi_1 -> phi_2 -> phi_3 (all ReLU)
    h = jnp.maximum(dense_bf16(x, w1, b1), 0.0).astype(act_dtype)   # (TB*N,128)
    h = jnp.maximum(dense_bf16(h, w2, b2), 0.0).astype(act_dtype)   # (TB*N,128)
    h = jnp.maximum(dense_bf16(h, w3, b3), 0.0)                     # (TB*N,256) f32

    # masked sum over points per event, f32 accumulation: (TB, 256)
    hm = h * m
    s = jnp.sum(hm.reshape(tb, n_pts, hm.shape[-1]), axis=1)

    # event-level MLP in f32 (negligible flops, tight parity with PyTorch)
    g = jnp.maximum(dense_f32(s, f1, g1), 0.0)            # (TB, 128)
    g = jnp.maximum(dense_f32(g, f2, g2), 0.0)
    g = jnp.maximum(dense_f32(g, f3, g3), 0.0)

    o_ref[...] = dense_f32(g, wo, bo)                     # (TB, 128)


def particle_flow_forward(x, mask, params, n_out_nodes, tb=None):
    """x: (B, N, input_dim) float32, mask: (B, N) float32 -> (B, n_out_nodes)."""
    B, N, D_in = x.shape

    (w1, b1, w2, b2, w3, b3, f1, g1, f2, g2, f3, g3, wo, bo) = params

    D_in8 = w1.shape[0]                # padded feature dim (>= D_in + 1)
    assert D_in8 >= D_in + 1, "need one zero-padded column for the mask"
    N_p = _pad_to(N, 8)                # keep reshapes on (8,128) boundaries
    OUT_P = 128

    if tb is None:
        # Target ~4096 rows per phi GEMM; tb a multiple of 8, capped at 512.
        target_rows = 4096
        tb = max(8, min((target_rows // N_p) // 8 * 8, 512))
        tb = min(tb, _pad_to(B, 8))
        # Prefer an even grid length (v7x megacore) when the batch allows it.
        if B > tb and (_pad_to(B, tb) // tb) % 2 == 1:
            for cand in range(tb, 7, -8):
                if (_pad_to(B, cand) // cand) % 2 == 0:
                    tb = cand
                    break
    B_p = _pad_to(B, tb)

    # Pad, fold the mask into column D_in, flatten points into one
    # lane-contiguous slab per TB events, and pre-cast to bf16 (halves DMA).
    x_p = jnp.zeros((B_p, N_p, D_in8), jnp.float32)
    x_p = x_p.at[:B, :N, :D_in].set(x.astype(jnp.float32))
    x_p = x_p.at[:B, :N, D_in].set(mask.astype(jnp.float32))
    x_p = x_p.reshape(B_p * N_p, D_in8).astype(jnp.bfloat16)

    # phi weights -> bf16 (MXU inputs); event-head weights stay f32.
    w1b, w2b, w3b = (a.astype(jnp.bfloat16) for a in (w1, w2, w3))

    def full_spec(arr):
        nd = arr.ndim
        return pl.BlockSpec(arr.shape, lambda b, _nd=nd: (0,) * _nd)

    in_specs = [
        pl.BlockSpec((tb * N_p, D_in8), lambda b: (b, 0)),   # x (+ folded mask)
        full_spec(w1b), full_spec(b1),   # phi_1
        full_spec(w2b), full_spec(b2),   # phi_2
        full_spec(w3b), full_spec(b3),   # phi_3
        full_spec(f1), full_spec(g1),    # F_1
        full_spec(f2), full_spec(g2),    # F_2
        full_spec(f3), full_spec(g3),    # F_3
        full_spec(wo), full_spec(bo),    # output_layer
    ]
    out_spec = pl.BlockSpec((tb, OUT_P), lambda b: (b, 0))

    kernel = functools.partial(
        particle_flow_kernel, tb=tb, n_pts=N_p, d_in=D_in,
        act_dtype=_activation_dtype())

    out_padded = pl.pallas_call(
        kernel,
        out_shape=jax.ShapeDtypeStruct((B_p, OUT_P), jnp.float32),
        grid_spec=pltpu.PrefetchScalarGridSpec(
            num_scalar_prefetch=0,
            grid=(B_p // tb,),
            in_specs=in_specs,
            out_specs=out_spec,
        ),
        compiler_params=pltpu.CompilerParams(
            dimension_semantics=("parallel",),      # megacore-shardable on v7x
            vmem_limit_bytes=32 * 1024 * 1024,      # fits v5e/v6e/v7x budgets
        ),
    )(x_p, w1b, b1, w2b, b2, w3b, b3, f1, g1, f2, g2, f3, g3, wo, bo)

    # NOTE: rows B..B_p of out_padded are relu-of-bias garbage; always slice.
    return out_padded[:B, :n_out_nodes]


def init_params(key, input_dim, n_out_nodes):
    """PyTorch-Linear-style uniform +-1/sqrt(fan_in) init, zero-padded to
    TPU-friendly sizes. phi_1's input dim is padded to a multiple of 8 with at
    least one spare (zero) column reserved for the folded particle mask."""
    D_in8 = _pad_to(input_dim + 1, 8)
    sizes = [  # (fan_in, fan_out, padded_in, padded_out)
        (input_dim, 100, D_in8, 128),    # phi_1
        (100, 100, 128, 128),            # phi_2
        (100, 256, 128, 256),            # phi_3
        (256, 100, 256, 128),            # F_1
        (100, 100, 128, 128),            # F_2
        (100, 100, 128, 128),            # F_3
        (100, n_out_nodes, 128, 128),    # output_layer
    ]
    params = []
    keys = jax.random.split(key, len(sizes) * 2)
    for i, (fi, fo, pi, po) in enumerate(sizes):
        bound = 1.0 / (fi ** 0.5)
        w = jax.random.uniform(keys[2 * i], (fi, fo), jnp.float32, -bound, bound)
        b = jax.random.uniform(keys[2 * i + 1], (fo,), jnp.float32, -bound, bound)
        w_p = jnp.zeros((pi, po), jnp.float32).at[:fi, :fo].set(w)
        b_p = jnp.zeros((1, po), jnp.float32).at[0, :fo].set(b)
        params += [w_p, b_p]
    return tuple(params)


def reference_forward(x, mask, params, n_out_nodes, phi_dtype=jnp.float32):
    """Pure-JAX reference with the same (padded) params.

    phi_dtype=bfloat16 mirrors the kernel's bf16-phi / f32-event-head math for
    a tight numerical check; float32 is the PyTorch-equivalent check.
    """
    (w1, b1, w2, b2, w3, b3, f1, g1, f2, g2, f3, g3, wo, bo) = params
    B, N, D_in = x.shape
    x_p = jnp.zeros((B, N, w1.shape[0]), jnp.float32).at[:, :, :D_in].set(x)

    def dense(a, w, b, dt):
        return jnp.dot(a.astype(dt), w.astype(dt),
                       preferred_element_type=jnp.float32) + b

    h = jax.nn.relu(dense(x_p.reshape(B * N, -1), w1, b1, phi_dtype))
    h = jax.nn.relu(dense(h, w2, b2, phi_dtype))
    h = jax.nn.relu(dense(h, w3, b3, phi_dtype))
    s = jnp.sum(h.reshape(B, N, -1) * mask[..., None], axis=1)
    g = jax.nn.relu(dense(s, f1, g1, jnp.float32))
    g = jax.nn.relu(dense(g, f2, g2, jnp.float32))
    g = jax.nn.relu(dense(g, f3, g3, jnp.float32))
    return dense(g, wo, bo, jnp.float32)[:, :n_out_nodes]


if __name__ == "__main__":
    # TODO(synk): the optional n_tokens/embedding input mode of the PyTorch
    # module is not implemented; only the input_dim (continuous-feature) path.
    B, N, INPUT_DIM = 2, 8, 4
    N_OUT = 2

    key = jax.random.PRNGKey(0)
    k_x, k_m, k_p = jax.random.split(key, 3)

    x = jax.random.normal(k_x, (B, N, INPUT_DIM), jnp.float32)
    # binary particle mask
    mask = (jax.random.uniform(k_m, (B, N)) > 0.3).astype(jnp.float32)

    params = init_params(k_p, INPUT_DIM, N_OUT)

    out = particle_flow_forward(x, mask, params, N_OUT)
    out = jax.block_until_ready(out)
    assert out.shape == (B, N_OUT)

    # Tight check vs a reference that mirrors the kernel's bf16-phi math.
    ref_bf16 = reference_forward(x, mask, params, N_OUT,
                                 phi_dtype=jnp.bfloat16)
    assert jnp.allclose(out, ref_bf16, atol=1e-3, rtol=1e-3), (
        float(jnp.max(jnp.abs(out - ref_bf16))))

    # Semantic check vs the full-f32 (PyTorch-equivalent) reference.
    ref_f32 = reference_forward(x, mask, params, N_OUT,
                                phi_dtype=jnp.float32)
    assert jnp.allclose(out, ref_f32, atol=5e-2, rtol=5e-2), (
        float(jnp.max(jnp.abs(out - ref_f32))))

    print("KERNEL_OK")
</pallas_src>

<mosaic_0001>
module attributes {stable_mosaic.version = 11 : i64} {
  func.func @particle_flow_kernel(%arg0: i32, %arg1: memref<64x8xbf16, #tpu.memory_space<vmem>>, %arg2: memref<8x128xbf16, #tpu.memory_space<vmem>>, %arg3: memref<1x128xf32, #tpu.memory_space<vmem>>, %arg4: memref<128x128xbf16, #tpu.memory_space<vmem>>, %arg5: memref<1x128xf32, #tpu.memory_space<vmem>>, %arg6: memref<128x256xbf16, #tpu.memory_space<vmem>>, %arg7: memref<1x256xf32, #tpu.memory_space<vmem>>, %arg8: memref<256x128xf32, #tpu.memory_space<vmem>>, %arg9: memref<1x128xf32, #tpu.memory_space<vmem>>, %arg10: memref<128x128xf32, #tpu.memory_space<vmem>>, %arg11: memref<1x128xf32, #tpu.memory_space<vmem>>, %arg12: memref<128x128xf32, #tpu.memory_space<vmem>>, %arg13: memref<1x128xf32, #tpu.memory_space<vmem>>, %arg14: memref<128x128xf32, #tpu.memory_space<vmem>>, %arg15: memref<1x128xf32, #tpu.memory_space<vmem>>, %arg16: memref<8x128xf32, #tpu.memory_space<vmem>>) attributes {dimension_semantics = [#tpu.dimension_semantics<parallel>], iteration_bounds = array<i64: 1>, scalar_prefetch = 0 : i64, scratch_operands = 0 : i64, tpu.core_type = #tpu.core_type<tc>, window_params = [{transform_indices = @transform_0, window_bounds = array<i64: 64, 8>}, {pipeline_mode = #tpu.pipeline_mode<synchronous>, transform_indices = @transform_1, window_bounds = array<i64: 8, 128>}, {pipeline_mode = #tpu.pipeline_mode<synchronous>, transform_indices = @transform_2, window_bounds = array<i64: 1, 128>}, {pipeline_mode = #tpu.pipeline_mode<synchronous>, transform_indices = @transform_3, window_bounds = array<i64: 128, 128>}, {pipeline_mode = #tpu.pipeline_mode<synchronous>, transform_indices = @transform_4, window_bounds = array<i64: 1, 128>}, {pipeline_mode = #tpu.pipeline_mode<synchronous>, transform_indices = @transform_5, window_bounds = array<i64: 128, 256>}, {pipeline_mode = #tpu.pipeline_mode<synchronous>, transform_indices = @transform_6, window_bounds = array<i64: 1, 256>}, {pipeline_mode = #tpu.pipeline_mode<synchronous>, transform_indices = @transform_7, window_bounds = array<i64: 256, 128>}, {pipeline_mode = #tpu.pipeline_mode<synchronous>, transform_indices = @transform_8, window_bounds = array<i64: 1, 128>}, {pipeline_mode = #tpu.pipeline_mode<synchronous>, transform_indices = @transform_9, window_bounds = array<i64: 128, 128>}, {pipeline_mode = #tpu.pipeline_mode<synchronous>, transform_indices = @transform_10, window_bounds = array<i64: 1, 128>}, {pipeline_mode = #tpu.pipeline_mode<synchronous>, transform_indices = @transform_11, window_bounds = array<i64: 128, 128>}, {pipeline_mode = #tpu.pipeline_mode<synchronous>, transform_indices = @transform_12, window_bounds = array<i64: 1, 128>}, {pipeline_mode = #tpu.pipeline_mode<synchronous>, transform_indices = @transform_13, window_bounds = array<i64: 128, 128>}, {pipeline_mode = #tpu.pipeline_mode<synchronous>, transform_indices = @transform_14, window_bounds = array<i64: 1, 128>}, {transform_indices = @transform_15, window_bounds = array<i64: 8, 128>}]} {
    %c0 = arith.constant 0 : index
    %c0_0 = arith.constant 0 : index
    %0 = vector.load %arg1[%c0, %c0_0] : memref<64x8xbf16, #tpu.memory_space<vmem>>, vector<64x8xbf16>
    %1 = vector.extract_strided_slice %0 {offsets = [0, 4], sizes = [64, 1], strides = [1, 1]} : vector<64x8xbf16> to vector<64x1xbf16>
    %2 = arith.extf %1 : vector<64x1xbf16> to vector<64x1xf32>
    %c0_1 = arith.constant 0 : index
    %c0_2 = arith.constant 0 : index
    %3 = vector.load %arg2[%c0_1, %c0_2] : memref<8x128xbf16, #tpu.memory_space<vmem>>, vector<8x128xbf16>
    %cst = arith.constant dense<0.000000e+00> : vector<64x128xf32>
    %4 = tpu.matmul %0, %3, %cst {dimension_numbers = #tpu.dot_dimension_numbers<[1], [0], [0], [1], [0, 0, 1, 1], [], []>} : vector<64x8xbf16>, vector<8x128xbf16>, vector<64x128xf32> -> vector<64x128xf32>
    %c0_3 = arith.constant 0 : index
    %c0_4 = arith.constant 0 : index
    %5 = vector.load %arg3[%c0_3, %c0_4] : memref<1x128xf32, #tpu.memory_space<vmem>>, vector<1x128xf32>
    %6 = vector.broadcast %5 : vector<1x128xf32> to vector<64x128xf32>
    %7 = arith.addf %4, %6 : vector<64x128xf32>
    %cst_5 = arith.constant 0.000000e+00 : f32
    %8 = vector.broadcast %cst_5 : f32 to vector<64x128xf32>
    %9 = arith.maximumf %7, %8 : vector<64x128xf32>
    %10 = arith.truncf %9 : vector<64x128xf32> to vector<64x128xbf16>
    %c0_6 = arith.constant 0 : index
    %c0_7 = arith.constant 0 : index
    %11 = vector.load %arg4[%c0_6, %c0_7] : memref<128x128xbf16, #tpu.memory_space<vmem>>, vector<128x128xbf16>
    %cst_8 = arith.constant dense<0.000000e+00> : vector<64x128xf32>
    %12 = tpu.matmul %10, %11, %cst_8 {dimension_numbers = #tpu.dot_dimension_numbers<[1], [0], [0], [1], [0, 0, 1, 1], [], []>} : vector<64x128xbf16>, vector<128x128xbf16>, vector<64x128xf32> -> vector<64x128xf32>
    %c0_9 = arith.constant 0 : index
    %c0_10 = arith.constant 0 : index
    %13 = vector.load %arg5[%c0_9, %c0_10] : memref<1x128xf32, #tpu.memory_space<vmem>>, vector<1x128xf32>
    %14 = vector.broadcast %13 : vector<1x128xf32> to vector<64x128xf32>
    %15 = arith.addf %12, %14 : vector<64x128xf32>
    %cst_11 = arith.constant 0.000000e+00 : f32
    %16 = vector.broadcast %cst_11 : f32 to vector<64x128xf32>
    %17 = arith.maximumf %15, %16 : vector<64x128xf32>
    %18 = arith.truncf %17 : vector<64x128xf32> to vector<64x128xbf16>
    %c0_12 = arith.constant 0 : index
    %c0_13 = arith.constant 0 : index
    %19 = vector.load %arg6[%c0_12, %c0_13] : memref<128x256xbf16, #tpu.memory_space<vmem>>, vector<128x256xbf16>
    %cst_14 = arith.constant dense<0.000000e+00> : vector<64x256xf32>
    %20 = tpu.matmul %18, %19, %cst_14 {dimension_numbers = #tpu.dot_dimension_numbers<[1], [0], [0], [1], [0, 0, 1, 1], [], []>} : vector<64x128xbf16>, vector<128x256xbf16>, vector<64x256xf32> -> vector<64x256xf32>
    %c0_15 = arith.constant 0 : index
    %c0_16 = arith.constant 0 : index
    %21 = vector.load %arg7[%c0_15, %c0_16] : memref<1x256xf32, #tpu.memory_space<vmem>>, vector<1x256xf32>
    %22 = vector.broadcast %21 : vector<1x256xf32> to vector<64x256xf32>
    %23 = arith.addf %20, %22 : vector<64x256xf32>
    %cst_17 = arith.constant 0.000000e+00 : f32
    %24 = vector.broadcast %cst_17 : f32 to vector<64x256xf32>
    %25 = arith.maximumf %23, %24 : vector<64x256xf32>
    %26 = vector.broadcast %2 : vector<64x1xf32> to vector<64x256xf32>
    %27 = arith.mulf %25, %26 : vector<64x256xf32>
    %28 = vector.shape_cast %27 : vector<64x256xf32> to vector<8x8x256xf32>
    %cst_18 = arith.constant dense<0.000000e+00> : vector<8x256xf32>
    %29 = vector.multi_reduction <add>, %28, %cst_18 [1] : vector<8x8x256xf32> to vector<8x256xf32>
    %c0_19 = arith.constant 0 : index
    %c0_20 = arith.constant 0 : index
    %30 = vector.load %arg8[%c0_19, %c0_20] : memref<256x128xf32, #tpu.memory_space<vmem>>, vector<256x128xf32>
    %cst_21 = arith.constant dense<0.000000e+00> : vector<8x128xf32>
    %31 = tpu.matmul %29, %30, %cst_21 {dimension_numbers = #tpu.dot_dimension_numbers<[1], [0], [0], [1], [0, 0, 1, 1], [], []>} : vector<8x256xf32>, vector<256x128xf32>, vector<8x128xf32> -> vector<8x128xf32>
    %c0_22 = arith.constant 0 : index
    %c0_23 = arith.constant 0 : index
    %32 = vector.load %arg9[%c0_22, %c0_23] : memref<1x128xf32, #tpu.memory_space<vmem>>, vector<1x128xf32>
    %33 = vector.broadcast %32 : vector<1x128xf32> to vector<8x128xf32>
    %34 = arith.addf %31, %33 : vector<8x128xf32>
    %cst_24 = arith.constant 0.000000e+00 : f32
    %35 = vector.broadcast %cst_24 : f32 to vector<8x128xf32>
    %36 = arith.maximumf %34, %35 : vector<8x128xf32>
    %c0_25 = arith.constant 0 : index
    %c0_26 = arith.constant 0 : index
    %37 = vector.load %arg10[%c0_25, %c0_26] : memref<128x128xf32, #tpu.memory_space<vmem>>, vector<128x128xf32>
    %cst_27 = arith.constant dense<0.000000e+00> : vector<8x128xf32>
    %38 = tpu.matmul %36, %37, %cst_27 {dimension_numbers = #tpu.dot_dimension_numbers<[1], [0], [0], [1], [0, 0, 1, 1], [], []>} : vector<8x128xf32>, vector<128x128xf32>, vector<8x128xf32> -> vector<8x128xf32>
    %c0_28 = arith.constant 0 : index
    %c0_29 = arith.constant 0 : index
    %39 = vector.load %arg11[%c0_28, %c0_29] : memref<1x128xf32, #tpu.memory_space<vmem>>, vector<1x128xf32>
    %40 = vector.broadcast %39 : vector<1x128xf32> to vector<8x128xf32>
    %41 = arith.addf %38, %40 : vector<8x128xf32>
    %cst_30 = arith.constant 0.000000e+00 : f32
    %42 = vector.broadcast %cst_30 : f32 to vector<8x128xf32>
    %43 = arith.maximumf %41, %42 : vector<8x128xf32>
    %c0_31 = arith.constant 0 : index
    %c0_32 = arith.constant 0 : index
    %44 = vector.load %arg12[%c0_31, %c0_32] : memref<128x128xf32, #tpu.memory_space<vmem>>, vector<128x128xf32>
    %cst_33 = arith.constant dense<0.000000e+00> : vector<8x128xf32>
    %45 = tpu.matmul %43, %44, %cst_33 {dimension_numbers = #tpu.dot_dimension_numbers<[1], [0], [0], [1], [0, 0, 1, 1], [], []>} : vector<8x128xf32>, vector<128x128xf32>, vector<8x128xf32> -> vector<8x128xf32>
    %c0_34 = arith.constant 0 : index
    %c0_35 = arith.constant 0 : index
    %46 = vector.load %arg13[%c0_34, %c0_35] : memref<1x128xf32, #tpu.memory_space<vmem>>, vector<1x128xf32>
    %47 = vector.broadcast %46 : vector<1x128xf32> to vector<8x128xf32>
    %48 = arith.addf %45, %47 : vector<8x128xf32>
    %cst_36 = arith.constant 0.000000e+00 : f32
    %49 = vector.broadcast %cst_36 : f32 to vector<8x128xf32>
    %50 = arith.maximumf %48, %49 : vector<8x128xf32>
    %c0_37 = arith.constant 0 : index
    %c0_38 = arith.constant 0 : index
    %51 = vector.load %arg14[%c0_37, %c0_38] : memref<128x128xf32, #tpu.memory_space<vmem>>, vector<128x128xf32>
    %cst_39 = arith.constant dense<0.000000e+00> : vector<8x128xf32>
    %52 = tpu.matmul %50, %51, %cst_39 {dimension_numbers = #tpu.dot_dimension_numbers<[1], [0], [0], [1], [0, 0, 1, 1], [], []>} : vector<8x128xf32>, vector<128x128xf32>, vector<8x128xf32> -> vector<8x128xf32>
    %c0_40 = arith.constant 0 : index
    %c0_41 = arith.constant 0 : index
    %53 = vector.load %arg15[%c0_40, %c0_41] : memref<1x128xf32, #tpu.memory_space<vmem>>, vector<1x128xf32>
    %54 = vector.broadcast %53 : vector<1x128xf32> to vector<8x128xf32>
    %55 = arith.addf %52, %54 : vector<8x128xf32>
    %c0_42 = arith.constant 0 : index
    %c0_43 = arith.constant 0 : index
    %56 = vector.load %arg16[%c0_42, %c0_43] : memref<8x128xf32, #tpu.memory_space<vmem>>, vector<8x128xf32>
    tpu.vector_store %arg16[%c0_42, %c0_43], %55 {strides = array<i32>} : memref<8x128xf32, #tpu.memory_space<vmem>>, vector<8x128xf32>,
    return
  }
  func.func @transform_0(%arg0: i32) -> (i32, i32) {
    %c0_i32 = arith.constant 0 : i32
    %c0_i32_0 = arith.constant 0 : i32
    return %arg0, %c0_i32 : i32, i32
  }
  func.func @transform_1(%arg0: i32) -> (i32, i32) {
    %c0_i32 = arith.constant 0 : i32
    %c0_i32_0 = arith.constant 0 : i32
    %c0_i32_1 = arith.constant 0 : i32
    return %c0_i32, %c0_i32_0 : i32, i32
  }
  func.func @transform_2(%arg0: i32) -> (i32, i32) {
    %c0_i32 = arith.constant 0 : i32
    %c0_i32_0 = arith.constant 0 : i32
    %c0_i32_1 = arith.constant 0 : i32
    return %c0_i32, %c0_i32_0 : i32, i32
  }
  func.func @transform_3(%arg0: i32) -> (i32, i32) {
    %c0_i32 = arith.constant 0 : i32
    %c0_i32_0 = arith.constant 0 : i32
    %c0_i32_1 = arith.constant 0 : i32
    return %c0_i32, %c0_i32_0 : i32, i32
  }
  func.func @transform_4(%arg0: i32) -> (i32, i32) {
    %c0_i32 = arith.constant 0 : i32
    %c0_i32_0 = arith.constant 0 : i32
    %c0_i32_1 = arith.constant 0 : i32
    return %c0_i32, %c0_i32_0 : i32, i32
  }
  func.func @transform_5(%arg0: i32) -> (i32, i32) {
    %c0_i32 = arith.constant 0 : i32
    %c0_i32_0 = arith.constant 0 : i32
    %c0_i32_1 = arith.constant 0 : i32
    return %c0_i32, %c0_i32_0 : i32, i32
  }
  func.func @transform_6(%arg0: i32) -> (i32, i32) {
    %c0_i32 = arith.constant 0 : i32
    %c0_i32_0 = arith.constant 0 : i32
    %c0_i32_1 = arith.constant 0 : i32
    return %c0_i32, %c0_i32_0 : i32, i32
  }
  func.func @transform_7(%arg0: i32) -> (i32, i32) {
    %c0_i32 = arith.constant 0 : i32
    %c0_i32_0 = arith.constant 0 : i32
    %c0_i32_1 = arith.constant 0 : i32
    return %c0_i32, %c0_i32_0 : i32, i32
  }
  func.func @transform_8(%arg0: i32) -> (i32, i32) {
    %c0_i32 = arith.constant 0 : i32
    %c0_i32_0 = arith.constant 0 : i32
    %c0_i32_1 = arith.constant 0 : i32
    return %c0_i32, %c0_i32_0 : i32, i32
  }
  func.func @transform_9(%arg0: i32) -> (i32, i32) {
    %c0_i32 = arith.constant 0 : i32
    %c0_i32_0 = arith.constant 0 : i32
    %c0_i32_1 = arith.constant 0 : i32
    return %c0_i32, %c0_i32_0 : i32, i32
  }
  func.func @transform_10(%arg0: i32) -> (i32, i32) {
    %c0_i32 = arith.constant 0 : i32
    %c0_i32_0 = arith.constant 0 : i32
    %c0_i32_1 = arith.constant 0 : i32
    return %c0_i32, %c0_i32_0 : i32, i32
  }
  func.func @transform_11(%arg0: i32) -> (i32, i32) {
    %c0_i32 = arith.constant 0 : i32
    %c0_i32_0 = arith.constant 0 : i32
    %c0_i32_1 = arith.constant 0 : i32
    return %c0_i32, %c0_i32_0 : i32, i32
  }
  func.func @transform_12(%arg0: i32) -> (i32, i32) {
    %c0_i32 = arith.constant 0 : i32
    %c0_i32_0 = arith.constant 0 : i32
    %c0_i32_1 = arith.constant 0 : i32
    return %c0_i32, %c0_i32_0 : i32, i32
  }
  func.func @transform_13(%arg0: i32) -> (i32, i32) {
    %c0_i32 = arith.constant 0 : i32
    %c0_i32_0 = arith.constant 0 : i32
    %c0_i32_1 = arith.constant 0 : i32
    return %c0_i32, %c0_i32_0 : i32, i32
  }
  func.func @transform_14(%arg0: i32) -> (i32, i32) {
    %c0_i32 = arith.constant 0 : i32
    %c0_i32_0 = arith.constant 0 : i32
    %c0_i32_1 = arith.constant 0 : i32
    return %c0_i32, %c0_i32_0 : i32, i32
  }
  func.func @transform_15(%arg0: i32) -> (i32, i32) {
    %c0_i32 = arith.constant 0 : i32
    %c0_i32_0 = arith.constant 0 : i32
    return %arg0, %c0_i32 : i32, i32
  }
}

</mosaic_0001>

<bundles_post_ra>
// kernel: tpu_custom_call.1
= control target key start
LH: loop header
LB: loop body
LE: loop exit
PB: predicated region body
PF: predicated region fallthrough
CT: control target
= control target key end

     0   :  { %20 = vsyncpa [#allocation3], 0  ;;  %s2024_s0 = inlined_call_operand.vmem [shape: bf16[64,8], index: 0, kind: input, shape index: {}]   ;;  %s2025_s1 = inlined_call_operand.vmem [shape: bf16[8,128], index: 1, kind: input, shape index: {}]   ;;  %s2026_s2 = inlined_call_operand.vmem [shape: f32[1,128], index: 2, kind: input, shape index: {}]   ;;  %s2027_s3 = inlined_call_operand.hbm [shape: bf16[128,128], index: 3, kind: input, shape index: {}]   ;;  %s2028_s4 = inlined_call_operand.vmem [shape: f32[1,128], index: 4, kind: input, shape index: {}]   ;;  %s2029_s5 = inlined_call_operand.hbm [shape: bf16[128,256], index: 5, kind: input, shape index: {}]   ;;  %s2030_s6 = inlined_call_operand.vmem [shape: f32[1,256], index: 6, kind: input, shape index: {}]   ;;  %s2031_s7 = inlined_call_operand.hbm [shape: f32[256,128], index: 7, kind: input, shape index: {}]   ;;  %s2032_s8 = inlined_call_operand.vmem [shape: f32[1,128], index: 8, kind: input, shape index: {}]   ;;  %s2033_s9 = inlined_call_operand.hbm [shape: f32[128,128], index: 9, kind: input, shape index: {}]   ;;  %s2034_s10 = inlined_call_operand.vmem [shape: f32[1,128], index: 10, kind: input, shape index: {}]   ;;  %s2035_s11 = inlined_call_operand.hbm [shape: f32[128,128], index: 11, kind: input, shape index: {}]   ;;  %s2036_s12 = inlined_call_operand.vmem [shape: f32[1,128], index: 12, kind: input, shape index: {}]   ;;  %s2037_s13 = inlined_call_operand.hbm [shape: f32[128,128], index: 13, kind: input, shape index: {}]   ;;  %s2038_s14 = inlined_call_operand.vmem [shape: f32[1,128], index: 14, kind: input, shape index: {}]   ;;  %s2039_s15 = inlined_call_operand.hbm [shape: f32[8,128], index: 15, kind: output, shape index: {}]  }
   0x1   :  { %21 = vsyncpa [#allocation6], 0 }
   0x2   :  { %22 = vsyncpa [#allocation9], 0 }
   0x3   :  { %23 = vsyncpa [#allocation12], 0 }
   0x4   :  { %24 = vsyncpa [#allocation4], 0  ;;  %s1726_s18 = smov [#allocation5]  }
   0x5   :  { %s50_s19 = sshll.u32 %s1726_s18, 4  ;;  %s51_s19 = int_to_ptr.vmem [resolvable:$true] %s50_s19 }
   0x6   :  { %s1584_s20 = scalar_lea.vmem %s51_s19, 2048  ;;  %p1589_p1 = scmp.lt.s32.totalorder %s51_s19, %s51_s19 }
   0x7   :  { %p1585_p0 = scmp.ne.s32.totalorder %s51_s19, %s1584_s20  ;;  %p1590_p2 = scmp.lt.s32.totalorder %s1584_s20, %s1584_s20 }
   0x9   :  { %p1591_p3 = por %p1590_p2, %p1589_p1 }
   0xb   :  { %p1592_p4 = pnand %p1591_p3, %p1585_p0 }
   0xd   :  { %1595 = shalt.err (!%p1592_p4)
}
   0xe   :  { %s1727_s21 = smov 128   ;;  %s1728_s22 = smov 8  }
   0xf   :  { %56 = dma.hbm_to_vmem [thread:$0]  %s2029_s5, 2048, %s51_s19, [#allocation6], %s1727_s21, %s1727_s21, %s1728_s22  }
  0x10   :  { %s1729_s25 = smov [#allocation8]   ;;  %s1730_s27 = smov [#allocation2]  }
  0x11   :  { %s78_s26 = sshll.u32 %s1729_s25, 4  ;;  %s36_s28 = sshll.u32 %s1730_s27, 4  ;;  %s79_s26 = int_to_ptr.vmem [resolvable:$true] %s78_s26  ;;  %s37_s28 = int_to_ptr.vmem [resolvable:$true] %s36_s28 }
  0x12   :  { %s1604_s29 = scalar_lea.vmem %s79_s26, 2048  ;;  %p1609_p6 = scmp.lt.s32.totalorder %s79_s26, %s79_s26 }
  0x13   :  { %p1605_p5 = scmp.ne.s32.totalorder %s79_s26, %s1604_s29  ;;  %p1610_p7 = scmp.lt.s32.totalorder %s1604_s29, %s1604_s29 }
  0x15   :  { %p1611_p8 = por %p1610_p7, %p1609_p6 }
  0x17   :  { %p1612_p9 = pnand %p1611_p8, %p1605_p5 }
  0x19   :  { %1615 = shalt.err (!%p1612_p9)
}
  0x1a   :  { %84 = dma.hbm_to_vmem [thread:$0]  %s2033_s9, 2048, %s79_s26, [#allocation9], %s1727_s21, %s1727_s21, %s1728_s22  }
  0x1b   :  { %s1624_s5 = scalar_lea.vmem %s37_s28, 1024  ;;  %p1629_p11 = scmp.lt.s32.totalorder %s37_s28, %s37_s28 }
  0x1c   :  { %p1625_p10 = scmp.ne.s32.totalorder %s37_s28, %s1624_s5  ;;  %p1630_p12 = scmp.lt.s32.totalorder %s1624_s5, %s1624_s5 }
  0x1e   :  { %p1631_p13 = por %p1630_p12, %p1629_p11 }
  0x20   :  { %p1632_p0 = pnand %p1631_p13, %p1625_p10 }
  0x22   :  { %1635 = shalt.err (!%p1632_p0)
}
  0x23   :  { %s1731_s17 = smov 64   ;;  %s1732_s18 = smov 4  }
  0x24   :  { %42 = dma.hbm_to_vmem [thread:$0]  %s2027_s3, 1024, %s37_s28, [#allocation3], %s1731_s17, %s1731_s17, %s1732_s18  }
  0x25   :  { %s1733_s23 = smov [#allocation7]   ;;  %s1734_s25 = smov [#allocation10]  }
  0x26   :  { %s64_s24 = sshll.u32 %s1733_s23, 4  ;;  %s92_s27 = sshll.u32 %s1734_s25, 4  ;;  %s65_s24 = int_to_ptr.vmem [resolvable:$true] %s64_s24  ;;  %s93_s27 = int_to_ptr.vmem [resolvable:$true] %s92_s27 }
  0x27   :  { %s1644_s9 = scalar_lea.vmem %s65_s24, 4096  ;;  %p1649_p2 = scmp.lt.s32.totalorder %s65_s24, %s65_s24 }
  0x28   :  { %p1645_p1 = scmp.ne.s32.totalorder %s65_s24, %s1644_s9  ;;  %p1650_p3 = scmp.lt.s32.totalorder %s1644_s9, %s1644_s9 }
  0x2a   :  { %p1651_p4 = por %p1650_p3, %p1649_p2 }
  0x2c   :  { %p1652_p5 = pnand %p1651_p4, %p1645_p1 }
  0x2e   :  { %1655 = shalt.err (!%p1652_p5)
}
  0x2f   :  { %70 = dma.hbm_to_vmem [thread:$0]  %s2031_s7, 4096, %s65_s24, [#allocation6], %s1727_s21, %s1727_s21, %s1728_s22  }
  0x30   :  { %s1664_s3 = scalar_lea.vmem %s93_s27, 2048  ;;  %p1669_p7 = scmp.lt.s32.totalorder %s93_s27, %s93_s27 }
  0x31   :  { %p1665_p6 = scmp.ne.s32.totalorder %s93_s27, %s1664_s3  ;;  %p1670_p8 = scmp.lt.s32.totalorder %s1664_s3, %s1664_s3 }
  0x33   :  { %p1671_p9 = por %p1670_p8, %p1669_p7 }
  0x35   :  { %p1672_p10 = pnand %p1671_p9, %p1665_p6 }
  0x37   :  { %1675 = shalt.err (!%p1672_p10)
}
  0x38   :  { %98 = dma.hbm_to_vmem [thread:$0]  %s2035_s11, 2048, %s93_s27, [#allocation9], %s1727_s21, %s1727_s21, %s1728_s22  }
  0x39   :  { %s1735_s16 = smov [#allocation11]  }
  0x3a   :  { %s106_s5 = sshll.u32 %s1735_s16, 4  ;;  %s107_s5 = int_to_ptr.vmem [resolvable:$true] %s106_s5 }
  0x3b   :  { %s1684_s17 = scalar_lea.vmem %s107_s5, 2048  ;;  %p1689_p12 = scmp.lt.s32.totalorder %s107_s5, %s107_s5 }
  0x3c   :  { %p1685_p11 = scmp.ne.s32.totalorder %s107_s5, %s1684_s17  ;;  %p1690_p13 = scmp.lt.s32.totalorder %s1684_s17, %s1684_s17 }
  0x3e   :  { %p1691_p0 = por %p1690_p13, %p1689_p12 }
  0x40   :  { %p1692_p1 = pnand %p1691_p0, %p1685_p11 }
  0x42   :  { %1695 = shalt.err (!%p1692_p1)
}
  0x43   :  { %112 = dma.hbm_to_vmem [thread:$0]  %s2037_s13, 2048, %s107_s5, [#allocation12], %s1727_s21, %s1727_s21, %s1728_s22  }
  0x44   :  { %1716 = dma.done.wait [#allocation3], 1024  }
  0x45   :  { %1717 = vsyncadd [#allocation3], 4294966272 }
  0x46   :  { %1718 = dma.done.wait [#allocation6], 6144  }
  0x47   :  { %1719 = vsyncadd [#allocation6], 4294961152 }
  0x48   :  { %1720 = dma.done.wait [#allocation9], 4096  }
  0x49   :  { %1721 = vsyncadd [#allocation9], 4294963200 }
  0x4a   :  { %1722 = dma.done.wait [#allocation12], 2048  }
  0x4b   :  { %1723 = vsyncadd [#allocation12], 4294965248  ;;  %vm191_vm0 = vcmask 1043456   ;;  %v150_v0 = vld [vmem:[%s2025_s1] sm:$0xf]  ;;  %vm178_vm1 = vcmask 64512  }
  0x4c   :  { %v1860_v1 = vld [vmem:[%s2024_s0] sm:$0xff]   ;;  %v1865_v2 = vld [vmem:[%s2024_s0 + $0x8] sm:$0xff]   ;;  %1498 = vmatprep.subr.msk.bf16.mxu0 %vm191_vm0, %v150_v0  ;;  %v193_v3 = vsel %vm191_vm0, %v150_v0, 0  ;;  %v1870_v4 = vld [vmem:[%s2024_s0 + $0x10] sm:$0xff]   ;;  %v1736_v59 = vmov 0   ;;  %v1737_v63 = vmov 4  }
  0x4d   :  { %1360 = vmatpush3.bf16.msra.mxu0 %v193_v3  ;;  %v1540_v5 = vld [vmem:[#allocation2 + $0x38] sm:$0xff]   ;;  %1361 = vmatprep.mubr.msk.bf16.mxu0 %vm178_vm1, %v1860_v1  ;;  %v1541_v6 = vld [vmem:[#allocation2 + $0x30] sm:$0xff]   ;;  %v1542_v8 = vld [vmem:[#allocation2 + $0x28] sm:$0xff]   ;;  %v142_v60 = vunpack.c.l.bf16 %v1860_v1  ;;  %v143_v61 = vunpack.c.h.bf16 %v1860_v1  ;;  %v144_v62 = vunpack.c.l.bf16 %v1865_v2  ;;  %v145_v0 = vunpack.c.h.bf16 %v1865_v2  ;;  %s1740_s5 = smov [#allocation13]  }
  0x4e   :  { %1369 = vmatprep.subr.bf16.mxu1 %v1540_v5  ;;  %v1879_v7 = vld [vmem:[%s2024_s0 + $0x18] sm:$0xff]   ;;  %v1543_v9 = vld [vmem:[#allocation2 + $0x20] sm:$0xff]   ;;  %v1545_v11 = vld [vmem:[#allocation2 + $0x10] sm:$0xff]   ;;  %1514 = vset.pattern.permute.xlu0 %v1737_v63  ;;  %v146_v3 = vunpack.c.l.bf16 %v1870_v4  ;;  %vm824_vm2 = vcmask 1041409   ;;  %vm826_vm3 = vcmask 1042434   ;;  %vm828_vm4 = vcmask 1043459  }
  0x4f   :  { %1370 = vmatpush3.bf16.msra.mxu1 %v1540_v5  ;;  %v1544_v10 = vld [vmem:[#allocation2 + $0x18] sm:$0xff]   ;;  %v1546_v12 = vld [vmem:[#allocation2 + $0x8] sm:$0xff]   ;;  %v1547_v13 = vld [vmem:[#allocation2] sm:$0xff]   ;;  %1525 = vset.pattern.permute.xlu1 %v1737_v63  ;;  %v147_v5 = vunpack.c.h.bf16 %v1870_v4  ;;  %vm830_vm5 = vcmask 1044484   ;;  %vm832_vm6 = vcmask 1045509   ;;  %vm834_vm7 = vcmask 1046534  }
  0x50   :  { %1362 = vmatmul.mubr.msk.bf16.vlgmr.msra.gmra.mxu0 %vm178_vm1, %v1865_v2  ;;  %1371 = vmatprep.subr.bf16.mxu1 %v1541_v6  ;;  %v1548_v14 = vld [vmem:[#allocation5 + $0x70] ss:$8 sps:$4 sm:$0xff]   ;;  %v1550_v15 = vld [vmem:[#allocation5 + $0x74] ss:$8 sps:$4 sm:$0xff]   ;;  %v1553_v16 = vld [vmem:[#allocation5 + $0x64] ss:$8 sps:$4 sm:$0xff]  }
  0x51   :  { %1365 = vmatprep.mubr.msk.bf16.mxu0 %vm178_vm1, %v1870_v4  ;;  %528 = vmatprep.subr.bf16.mxu0 %v1550_v15  ;;  %v1551_v17 = vld [vmem:[#allocation5 + $0x60] ss:$8 sps:$4 sm:$0xff]   ;;  %v1556_v18 = vld [vmem:[#allocation5 + $0x54] ss:$8 sps:$4 sm:$0xff]   ;;  %v1554_v19 = vld [vmem:[#allocation5 + $0x50] ss:$8 sps:$4 sm:$0xff]  }
  0x52   :  { %529 = vmatpush1.bf16.msra.mxu0 %v1548_v14  ;;  %v1559_v20 = vld [vmem:[#allocation5 + $0x44] ss:$8 sps:$4 sm:$0xff]   ;;  %v1557_v21 = vld [vmem:[#allocation5 + $0x40] ss:$8 sps:$4 sm:$0xff]   ;;  %v1562_v22 = vld [vmem:[#allocation5 + $0x34] ss:$8 sps:$4 sm:$0xff]  }
  0x53   :  { %1372 = vmatpush3.bf16.msra.mxu1 %v1541_v6  ;;  %530 = vmatprep.subr.bf16.mxu0 %v1553_v16  ;;  %v1560_v23 = vld [vmem:[#allocation5 + $0x30] ss:$8 sps:$4 sm:$0xff]   ;;  %v1218_v26 = vld [vmem:[%s2026_s2] ss:$0 sm:$0xff]  ;;  %v1565_v53 = vld [vmem:[#allocation5 + $0x24] ss:$8 sps:$4 sm:$0xff]   ;;  %v148_v6 = vunpack.c.l.bf16 %v1879_v7 }
  0x54   :  { %1373 = vmatprep.subr.bf16.mxu1 %v1542_v8  ;;  %v1563_v54 = vld [vmem:[#allocation5 + $0x20] ss:$8 sps:$4 sm:$0xff]   ;;  %v1568_v55 = vld [vmem:[#allocation5 + $0x14] ss:$8 sps:$4 sm:$0xff]   ;;  %v1566_v56 = vld [vmem:[#allocation5 + $0x10] ss:$8 sps:$4 sm:$0xff]  }
  0x55   :  { %v1571_v57 = vld [vmem:[#allocation5 + $0x4] ss:$8 sps:$4 sm:$0xff]   ;;  %v1569_v58 = vld [vmem:[#allocation5] ss:$8 sps:$4 sm:$0xff]   ;;  %v772_v63 = vld [vmem:[#allocation7 + $0x18] sm:$0xff]  ;;  %vm836_vm8 = vcmask 1047559  }
  0x56   :  { %531 = vmatpush1.bf16.msra.mxu0 %v1551_v17  ;;  %v1227_v2 = vld [vmem:[%s2028_s4] ss:$0 sm:$0xff]  ;;  %vm1739_vm9 = vmmov 0   ;;  %s1206_s17 = sshll.u32 %s1740_s5, 4  ;;  %s1207_s17 = int_to_ptr.vmem [resolvable:$true] %s1206_s17 }
  0x57   :  { %1374 = vmatpush3.bf16.msra.mxu1 %v1542_v8  ;;  %532 = vmatprep.subr.bf16.mxu0 %v1556_v18  ;;  %v1515_v8 = vpack.i.bf16 %v143_v61, %v142_v60  ;;  %v789_v60 = vld [vmem:[#allocation7 + $0xa0] sm:$0xff]  ;;  %s1696_s7 = scalar_lea.vmem %s1207_s17, 128  ;;  %p1701_p3 = scmp.lt.s32.totalorder %s1207_s17, %s1207_s17 }
  0x58   :  { %1366 = vmatmul.mubr.msk.bf16.gmra.mxu0 %vm178_vm1, %v1879_v7  ;;  %1375 = vmatprep.subr.bf16.mxu1 %v1543_v9  ;;  %v773_v61 = vld [vmem:[#allocation7 + $0x20] sm:$0xff]  ;;  %p1697_p2 = scmp.ne.s32.totalorder %s1207_s17, %s1696_s7  ;;  %p1702_p4 = scmp.lt.s32.totalorder %s1696_s7, %s1696_s7 }
  0x59   :  { %560 = vmatprep.mubr.bf16.mxu0 %v1736_v59  ;;  %1516 = vperm.xlu0 %1514, %v1515_v8   ;;  %v785_v8 = vld [vmem:[#allocation7 + $0x80] sm:$0xff] }
  0x5a   :  { %533 = vmatpush1.bf16.msra.mxu0 %v1554_v19  ;;  %p1703_p5 = por %p1702_p4, %p1701_p3 }
  0x5b   :  { %1376 = vmatpush3.bf16.msra.mxu1 %v1543_v9  ;;  %534 = vmatprep.subr.bf16.mxu0 %v1559_v20  ;;  %v149_v9 = vunpack.c.h.bf16 %v1879_v7 }
  0x5c   :  { %1377 = vmatprep.subr.bf16.mxu1 %v1544_v10  ;;  %p1704_p6 = pnand %p1703_p5, %p1697_p2 }
  0x5d   :  { %v1531_v1 = vpack.i.bf16 %v149_v9, %v148_v6  ;;  %v770_v6 = vld [vmem:[#allocation7 + $0x8] sm:$0xff]  ;;  %v769_v9 = vld [vmem:[#allocation7] sm:$0xff] }
  0x5e   :  { %535 = vmatpush1.bf16.msra.mxu0 %v1557_v21 }
  0x5f   :  { %1378 = vmatpush3.bf16.msra.mxu1 %v1544_v10  ;;  %536 = vmatprep.subr.bf16.mxu0 %v1562_v22  ;;  %v1526_v10 = vpack.i.bf16 %v147_v5, %v146_v3  ;;  %v771_v3 = vld [vmem:[#allocation7 + $0x10] sm:$0xff]  ;;  %v786_v5 = vld [vmem:[#allocation7 + $0x88] sm:$0xff] }
  0x60   :  { %1379 = vmatprep.subr.bf16.mxu1 %v1545_v11 }
  0x61   :  { %1527 = vperm.xlu1 %1525, %v1526_v10   ;;  %v933_v10 = vld [vmem:[#allocation8 + $0x78] sm:$0xff] }
  0x62   :  { %537 = vmatpush1.bf16.msra.mxu0 %v1560_v23 }
  0x63   :  { %1380 = vmatpush3.bf16.msra.mxu1 %v1545_v11  ;;  %538 = vmatprep.subr.bf16.mxu0 %v1565_v53  ;;  %v1520_v11 = vpack.i.bf16 %v145_v0, %v144_v62  ;;  %v777_v53 = vld [vmem:[#allocation7 + $0x40] sm:$0xff]  ;;  %v788_v62 = vld [vmem:[#allocation7 + $0x98] sm:$0xff]  ;;  %v787_v0 = vld [vmem:[#allocation7 + $0x90] sm:$0xff] }
  0x64   :  { %1381 = vmatprep.subr.bf16.mxu1 %v1546_v12 }
  0x65   :  { %1521 = vperm.xlu0 %1514, %v1520_v11   ;;  %1532 = vperm.xlu1 %1525, %v1531_v1   ;;  %v1738_v11 = vmov 0.0   ;;  %v932_v1 = vld [vmem:[#allocation8 + $0x70] sm:$0xff] }
  0x66   :  { %539 = vmatpush1.bf16.msra.mxu0 %v1563_v54  ;;  %v792_v54 = vld [vmem:[#allocation7 + $0xb8] sm:$0xff] }
  0x67   :  { %1382 = vmatpush3.bf16.msra.mxu1 %v1546_v12  ;;  %540 = vmatprep.subr.bf16.mxu0 %v1568_v55  ;;  %v776_v55 = vld [vmem:[#allocation7 + $0x38] sm:$0xff] }
  0x68   :  { %1383 = vmatprep.subr.bf16.mxu1 %v1547_v13 }
  0x6a   :  { %541 = vmatpush1.bf16.msra.mxu0 %v1566_v56  ;;  %v791_v56 = vld [vmem:[#allocation7 + $0xb0] sm:$0xff] }
  0x6b   :  { %1384 = vmatpush3.bf16.msra.mxu1 %v1547_v13  ;;  %542 = vmatprep.subr.bf16.mxu0 %v1571_v57  ;;  %v775_v57 = vld [vmem:[#allocation7 + $0x30] sm:$0xff] }
  0x6e   :  { %543 = vmatpush1.bf16.msra.mxu0 %v1569_v58  ;;  %v790_v58 = vld [vmem:[#allocation7 + $0xa8] sm:$0xff] }
  0x6f   :  { %1393 = vmatprep.subr.mxu0 %v1738_v11 }
 0x110   :  { %v1363_v24 = vpop.f32.mrf.mxu0 }
 0x111   :  { %v238_v30 = vadd.f32 %v1363_v24, %v1218_v26 }
 0x112   :  { %v229_v25 = vpop.f32.mrf.mxu0 }
 0x113   :  { %v230_v28 = vadd.f32 %v1218_v26, %v229_v25  ;;  %v262_v37 = vmax.f32 %v238_v30, 0.0 }
 0x114   :  { %v1364_v27 = vpop.f32.mrf.mxu0 }
 0x115   :  { %v241_v29 = vadd.f32 %v1364_v27, %v1218_v26  ;;  %v260_v35 = vmax.f32 %v230_v28, 0.0 }
 0x116   :  { %v232_v31 = vpop.f32.mrf.mxu0 }
 0x117   :  { %v233_v32 = vadd.f32 %v1218_v26, %v232_v31  ;;  %v263_v33 = vmax.f32 %v241_v29, 0.0 }
 0x118   :  { %v1367_v34 = vpop.f32.mrf.mxu0 }
 0x119   :  { %v261_v36 = vmax.f32 %v233_v32, 0.0  ;;  %v254_v38 = vadd.f32 %v1367_v34, %v1218_v26  ;;  %v269_v42 = vpack.c.bf16 %v263_v33, %v262_v37 }
 0x11a   :  { %v245_v39 = vpop.f32.mrf.mxu0 }
 0x11b   :  { %v246_v40 = vadd.f32 %v1218_v26, %v245_v39  ;;  %v268_v41 = vpack.c.bf16 %v261_v36, %v260_v35  ;;  %v266_v45 = vmax.f32 %v254_v38, 0.0  ;;  %v800_v38 = vld [vmem:[#allocation7 + $0xf8] sm:$0xff] }
 0x11c   :  { %v1368_v43 = vpop.f32.mrf.mxu0  ;;  %1273 = vmatprep.subr.mxu1 %v800_v38  ;;  %v784_v39 = vld [vmem:[#allocation7 + $0x78] sm:$0xff] }
 0x11d   :  { %v257_v44 = vadd.f32 %v1368_v43, %v1218_v26  ;;  %1385 = vmatprep.mubr.bf16.mxu1 %v268_v41  ;;  %v264_v47 = vmax.f32 %v246_v40, 0.0  ;;  %v799_v40 = vld [vmem:[#allocation7 + $0xf0] sm:$0xff]  ;;  %v782_v43 = vld [vmem:[#allocation7 + $0x68] sm:$0xff] }
 0x11e   :  { %v248_v46 = vpop.f32.mrf.mxu0  ;;  %1386 = vmatmul.mubr.bf16.vlgmr.msra.gmra.mxu1 %v269_v42  ;;  %v783_v41 = vld [vmem:[#allocation7 + $0x70] sm:$0xff]  ;;  %v798_v42 = vld [vmem:[#allocation7 + $0xe8] sm:$0xff] }
 0x11f   :  { %v267_v48 = vmax.f32 %v257_v44, 0.0  ;;  %v249_v49 = vadd.f32 %v1218_v26, %v248_v46  ;;  %1274 = vmatpush3.msra.mxu1 %v784_v39  ;;  %v797_v44 = vld [vmem:[#allocation7 + $0xe0] sm:$0xff]  ;;  %v796_v46 = vld [vmem:[#allocation7 + $0xd8] sm:$0xff] }
 0x120   :  { %1275 = vmatprep.subr.mxu1 %v799_v40 }
 0x121   :  { %v265_v50 = vmax.f32 %v249_v49, 0.0  ;;  %v271_v51 = vpack.c.bf16 %v267_v48, %v266_v45  ;;  %1276 = vmatpush3.msra.mxu1 %v783_v41  ;;  %v781_v45 = vld [vmem:[#allocation7 + $0x60] sm:$0xff]  ;;  %v795_v48 = vld [vmem:[#allocation7 + $0xd0] sm:$0xff] }
 0x122   :  { %1277 = vmatprep.subr.mxu1 %v798_v42  ;;  %v779_v49 = vld [vmem:[#allocation7 + $0x50] sm:$0xff] }
 0x123   :  { %v270_v52 = vpack.c.bf16 %v265_v50, %v264_v47  ;;  %1278 = vmatpush3.msra.mxu1 %v782_v43  ;;  %v780_v47 = vld [vmem:[#allocation7 + $0x58] sm:$0xff]  ;;  %v794_v50 = vld [vmem:[#allocation7 + $0xc8] sm:$0xff] }
 0x124   :  { %1279 = vmatprep.subr.mxu1 %v797_v44 }
 0x125   :  { %1389 = vmatprep.mubr.bf16.mxu1 %v270_v52  ;;  %1280 = vmatpush3.msra.mxu1 %v781_v45  ;;  %v793_v52 = vld [vmem:[#allocation7 + $0xc0] sm:$0xff] }
 0x126   :  { %1390 = vmatmul.mubr.bf16.gmra.mxu1 %v271_v51  ;;  %1281 = vmatprep.subr.mxu1 %v796_v46  ;;  %v778_v51 = vld [vmem:[#allocation7 + $0x48] sm:$0xff] }
 0x127   :  { %1282 = vmatpush3.msra.mxu1 %v780_v47 }
 0x128   :  { %1283 = vmatprep.subr.mxu1 %v795_v48 }
 0x129   :  { %1284 = vmatpush3.msra.mxu1 %v779_v49 }
 0x12a   :  { %1285 = vmatprep.subr.mxu1 %v794_v50 }
 0x12b   :  { %1286 = vmatpush3.msra.mxu1 %v778_v51 }
 0x12c   :  { %1287 = vmatprep.subr.mxu1 %v793_v52 }
 0x12d   :  { %1288 = vmatpush3.msra.mxu1 %v777_v53 }
 0x12e   :  { %1289 = vmatprep.subr.mxu1 %v792_v54 }
 0x12f   :  { %1290 = vmatpush3.msra.mxu1 %v776_v55 }
 0x130   :  { %1291 = vmatprep.subr.mxu1 %v791_v56 }
 0x131   :  { %1292 = vmatpush3.msra.mxu1 %v775_v57 }
 0x132   :  { %1293 = vmatprep.subr.mxu1 %v790_v58 }
 0x1de   :  { %v1387_v12 = vpop.f32.mrf.mxu1 }
 0x1df   :  { %v386_v23 = vadd.f32 %v1387_v12, %v1227_v2  ;;  %v931_v12 = vld [vmem:[#allocation8 + $0x68] sm:$0xff] }
 0x1e0   :  { %v377_v13 = vpop.f32.mrf.mxu1 }
 0x1e1   :  { %v378_v4 = vadd.f32 %v1227_v2, %v377_v13  ;;  %v410_v26 = vmax.f32 %v386_v23, 0.0  ;;  %v930_v13 = vld [vmem:[#allocation8 + $0x60] sm:$0xff] }
 0x1e2   :  { %v1388_v14 = vpop.f32.mrf.mxu1 }
 0x1e3   :  { %v408_v18 = vmax.f32 %v378_v4, 0.0  ;;  %v389_v20 = vadd.f32 %v1388_v14, %v1227_v2  ;;  %v928_v14 = vld [vmem:[#allocation8 + $0x50] sm:$0xff]  ;;  %v927_v4 = vld [vmem:[#allocation8 + $0x48] sm:$0xff] }
 0x1e4   :  { %v380_v15 = vpop.f32.mrf.mxu1 }
 0x1e5   :  { %v381_v16 = vadd.f32 %v1227_v2, %v380_v15  ;;  %v411_v24 = vmax.f32 %v389_v20, 0.0  ;;  %v926_v15 = vld [vmem:[#allocation8 + $0x40] sm:$0xff] }
 0x1e6   :  { %v1391_v17 = vpop.f32.mrf.mxu1 }
 0x1e7   :  { %v409_v7 = vmax.f32 %v381_v16, 0.0  ;;  %v417_v27 = vpack.c.bf16 %v411_v24, %v410_v26  ;;  %v402_v34 = vadd.f32 %v1391_v17, %v1227_v2  ;;  %v925_v16 = vld [vmem:[#allocation8 + $0x38] sm:$0xff]  ;;  %v924_v17 = vld [vmem:[#allocation8 + $0x30] sm:$0xff] }
 0x1e8   :  { %v393_v19 = vpop.f32.mrf.mxu1 }
 0x1e9   :  { %v416_v21 = vpack.c.bf16 %v409_v7, %v408_v18  ;;  %v394_v29 = vadd.f32 %v1227_v2, %v393_v19  ;;  %v414_v36 = vmax.f32 %v402_v34, 0.0  ;;  %v923_v18 = vld [vmem:[#allocation8 + $0x28] sm:$0xff]  ;;  %v922_v7 = vld [vmem:[#allocation8 + $0x20] sm:$0xff]  ;;  %v438_v19 = vlaneseq }
 0x1ea   :  { %v1392_v22 = vpop.f32.mrf.mxu1 }
 0x1eb   :  { %561 = vmatmul.mubr.bf16.vlgmr.msra.gmra.mxu0 %v416_v21  ;;  %v412_v31 = vmax.f32 %v394_v29, 0.0  ;;  %v405_v32 = vadd.f32 %v1392_v22, %v1227_v2  ;;  %v439_v20 = vshrl.u32 %v438_v19, 7  ;;  %v436_v22 = vld [vmem:[%s2030_s6] sm:$0x3] }
 0x1ec   :  { %570 = vmatprep.mubr.bf16.mxu0 %v1736_v59  ;;  %v396_v25 = vpop.f32.mrf.mxu1  ;;  %1394 = vmatpush3.msra.mxu0 %v933_v10 }
 0x1ed   :  { %v397_v28 = vadd.f32 %v1227_v2, %v396_v25  ;;  %v415_v35 = vmax.f32 %v405_v32, 0.0  ;;  %1395 = vmatprep.subr.mxu0 %v1738_v11  ;;  %v929_v2 = vld [vmem:[#allocation8 + $0x58] sm:$0xff]  ;;  %v440_v21 = vsub.s32 0, %v439_v20  ;;  %v444_v23 = vsub.s32 1, %v439_v20 }
 0x1ee   :  { %1396 = vmatpush3.msra.mxu0 %v932_v1 }
 0x1ef   :  { %v413_v30 = vmax.f32 %v397_v28, 0.0  ;;  %v419_v37 = vpack.c.bf16 %v415_v35, %v414_v36  ;;  %1397 = vmatprep.subr.mxu0 %v1738_v11  ;;  %v1916_v24 = vrot.slane %v436_v22, %v440_v21  ;;  %v1918_v25 = vrot.slane %v436_v22, %v444_v23 }
 0x1f0   :  { %1398 = vmatpush3.msra.mxu0 %v931_v12  ;;  %v1528_v12 = vpop.permute.xlu1 %1527 }
 0x1f1   :  { %v418_v33 = vpack.c.bf16 %v413_v30, %v412_v31  ;;  %1399 = vmatprep.subr.mxu0 %v1738_v11 }
 0x1f2   :  { %1400 = vmatpush3.msra.mxu0 %v930_v13 }
 0x1f3   :  { %571 = vmatmul.mubr.bf16.gmra.mxu0 %v417_v27  ;;  %1401 = vmatprep.subr.mxu0 %v1738_v11  ;;  %v1517_v27 = vpop.permute.xlu0 %1516 }
 0x1f4   :  { %580 = vmatprep.mubr.bf16.mxu0 %v1736_v59  ;;  %1402 = vmatpush3.msra.mxu0 %v929_v2  ;;  %v1518_v32 = vunpack.i.l.bf16 %v1517_v27  ;;  %v1519_v35 = vunpack.i.h.bf16 %v1517_v27 }
 0x1f5   :  { %1403 = vmatprep.subr.mxu0 %v1738_v11 }
 0x1f6   :  { %1404 = vmatpush3.msra.mxu0 %v928_v14 }
 0x1f7   :  { %1405 = vmatprep.subr.mxu0 %v1738_v11  ;;  %v1522_v42 = vpop.permute.xlu0 %1521 }
 0x1f8   :  { %1406 = vmatpush3.msra.mxu0 %v927_v4  ;;  %v1523_v49 = vunpack.i.l.bf16 %v1522_v42 }
 0x1f9   :  { %1407 = vmatprep.subr.mxu0 %v1738_v11 }
 0x1fa   :  { %1408 = vmatpush3.msra.mxu0 %v926_v15 }
 0x1fb   :  { %581 = vmatmul.mubr.bf16.gmra.mxu0 %v418_v33  ;;  %1409 = vmatprep.subr.mxu0 %v1738_v11 }
 0x1fc   :  { %590 = vmatprep.mubr.bf16.mxu0 %v1736_v59  ;;  %v774_v59 = vld [vmem:[#allocation7 + $0x28] sm:$0xff]  ;;  %1410 = vmatpush3.msra.mxu0 %v925_v16 }
 0x1fd   :  { %1294 = vmatpush3.msra.mxu1 %v774_v59  ;;  %1411 = vmatprep.subr.mxu0 %v1738_v11 }
 0x1fe   :  { %1295 = vmatprep.subr.mxu1 %v789_v60  ;;  %1412 = vmatpush3.msra.mxu0 %v924_v17 }
 0x1ff   :  { %1296 = vmatpush3.msra.mxu1 %v773_v61  ;;  %1413 = vmatprep.subr.mxu0 %v1738_v11 }
 0x200   :  { %1297 = vmatprep.subr.mxu1 %v788_v62  ;;  %1414 = vmatpush3.msra.mxu0 %v923_v18  ;;  %v1529_v18 = vunpack.i.l.bf16 %v1528_v12 }
 0x201   :  { %1298 = vmatpush3.msra.mxu1 %v772_v63  ;;  %1415 = vmatprep.subr.mxu0 %v1738_v11 }
 0x202   :  { %1299 = vmatprep.subr.mxu1 %v787_v0  ;;  %1416 = vmatpush3.msra.mxu0 %v922_v7 }
 0x203   :  { %591 = vmatmul.mubr.bf16.gmra.mxu0 %v419_v37  ;;  %1300 = vmatpush3.msra.mxu1 %v771_v3 }
 0x204   :  { %1301 = vmatprep.subr.mxu1 %v786_v5  ;;  %1417 = vmatprep.subr.mxu0 %v1738_v11  ;;  %v1524_v5 = vunpack.i.h.bf16 %v1522_v42 }
 0x205   :  { %1302 = vmatpush3.msra.mxu1 %v770_v6  ;;  %1425 = vmatprep.mubr.msk.f32.mxu0 %vm1739_vm9, %v1738_v11 }
 0x206   :  { %1303 = vmatprep.subr.mxu1 %v785_v8 }
 0x207   :  { %1304 = vmatpush3.msra.mxu1 %v769_v9 }
 0x208   :  { %1428 = vmatprep.subr.mxu1 %v1738_v11 }
 0x2ab   :  { %v562_v26 = vpop.f32.mrf.mxu0 }
 0x2ac   :  { %v563_v28 = vadd.f32 %v562_v26, %v1916_v24 }
 0x2ad   :  { %v564_v29 = vpop.f32.mrf.mxu0 }
 0x2ae   :  { %v601_v30 = vmax.f32 %v563_v28, 0.0  ;;  %v565_v31 = vadd.f32 %v564_v29, %v1918_v25 }
 0x2af   :  { %v566_v33 = vpop.f32.mrf.mxu0 }
 0x2b0   :  { %v602_v34 = vmax.f32 %v565_v31, 0.0  ;;  %v567_v36 = vadd.f32 %v566_v33, %v1916_v24  ;;  %v657_v38 = vmul.f32 %v1518_v32, %v601_v30  ;;  %v1930_v31 = vpop.permute.xlu1 %1532  ;;  %v1530_v33 = vunpack.i.h.bf16 %v1528_v12 }
 0x2b1   :  { %v568_v37 = vpop.f32.mrf.mxu0 }
 0x2b2   :  { %v658_v39 = vmul.f32 %v1518_v32, %v602_v34  ;;  %v603_v40 = vmax.f32 %v567_v36, 0.0  ;;  %v569_v41 = vadd.f32 %v568_v37, %v1918_v25  ;;  %v673_v50 = vrot.slane %v657_v38, 4 }
 0x2b3   :  { %v572_v43 = vpop.f32.mrf.mxu0 }
 0x2b4   :  { %v679_v44 = vrot.slane %v658_v39, 4  ;;  %v659_v45 = vmul.f32 %v1519_v35, %v603_v40  ;;  %v604_v46 = vmax.f32 %v569_v41, 0.0  ;;  %v573_v47 = vadd.f32 %v572_v43, %v1916_v24 }
 0x2b5   :  { %v574_v48 = vpop.f32.mrf.mxu0  ;;  %v674_v63 = vadd.f32 %v673_v50, %v657_v38 }
 0x2b6   :  { %v680_v51 = vadd.f32 %v679_v44, %v658_v39  ;;  %v685_v52 = vrot.slane %v659_v45, 4  ;;  %v660_v53 = vmul.f32 %v1519_v35, %v604_v46  ;;  %v605_v54 = vmax.f32 %v573_v47, 0.0 }
 0x2b7   :  { %v575_v55 = vadd.f32 %v574_v48, %v1918_v25  ;;  %v576_v56 = vpop.f32.mrf.mxu0  ;;  %v675_v16 = vrot.slane %v674_v63, 2  ;;  %v1534_v44 = vunpack.i.l.bf16 %v1930_v31  ;;  %v1535_v48 = vunpack.i.h.bf16 %v1930_v31 }
 0x2b8   :  { %v686_v57 = vadd.f32 %v685_v52, %v659_v45  ;;  %v691_v58 = vrot.slane %v660_v53, 4  ;;  %v661_v60 = vmul.f32 %v1523_v49, %v605_v54  ;;  %v577_v61 = vadd.f32 %v576_v56, %v1916_v24 }
 0x2b9   :  { %v606_v59 = vmax.f32 %v575_v55, 0.0  ;;  %v578_v62 = vpop.f32.mrf.mxu0  ;;  %v681_v0 = vrot.slane %v680_v51, 2  ;;  %v1932_v36 = vadd.f32 %v675_v16, %v674_v63 }
 0x2ba   :  { %v692_v3 = vadd.f32 %v691_v58, %v660_v53  ;;  %v687_v6 = vrot.slane %v686_v57, 2  ;;  %v697_v8 = vrot.slane %v661_v60, 4  ;;  %v607_v9 = vmax.f32 %v577_v61, 0.0 }
 0x2bb   :  { %v579_v10 = vadd.f32 %v578_v62, %v1918_v25  ;;  %v582_v1 = vpop.f32.mrf.mxu0  ;;  %v662_v2 = vmul.f32 %v1523_v49, %v606_v59  ;;  %v682_v7 = vadd.f32 %v681_v0, %v680_v51  ;;  %v677_v54 = vrot.slane %v1932_v36, 1 }
 0x2bc   :  { %v693_v13 = vrot.slane %v692_v3, 2  ;;  %v698_v14 = vadd.f32 %v697_v8, %v661_v60  ;;  %v583_v17 = vadd.f32 %v582_v1, %v1916_v24  ;;  %v688_v19 = vadd.f32 %v687_v6, %v686_v57 }
 0x2bd   :  { %v608_v4 = vmax.f32 %v579_v10, 0.0  ;;  %v584_v15 = vpop.f32.mrf.mxu0  ;;  %v663_v20 = vmul.f32 %v1524_v5, %v607_v9  ;;  %v703_v29 = vrot.slane %v662_v2, 4  ;;  %v683_v37 = vrot.slane %v682_v7, 1 }
 0x2be   :  { %v609_v23 = vmax.f32 %v583_v17, 0.0  ;;  %v585_v26 = vadd.f32 %v584_v15, %v1918_v25  ;;  %v694_v27 = vadd.f32 %v693_v13, %v692_v3  ;;  %v699_v28 = vrot.slane %v698_v14, 2 }
 0x2bf   :  { %v664_v21 = vmul.f32 %v1524_v5, %v608_v4  ;;  %v586_v22 = vpop.f32.mrf.mxu0  ;;  %v689_v38 = vrot.slane %v688_v19, 1  ;;  %v709_v39 = vrot.slane %v663_v20, 4  ;;  %v704_v47 = vadd.f32 %v703_v29, %v662_v2 }
 0x2c0   :  { %v665_v34 = vmul.f32 %v1529_v18, %v609_v23  ;;  %v610_v35 = vmax.f32 %v585_v26, 0.0  ;;  %v587_v43 = vadd.f32 %v586_v22, %v1916_v24  ;;  %v695_v45 = vrot.slane %v694_v27, 1 }
 0x2c1   :  { %v588_v30 = vpop.f32.mrf.mxu0  ;;  %v715_v32 = vrot.slane %v664_v21, 4  ;;  %v1936_v46 = vadd.f32 %v699_v28, %v698_v14  ;;  %v1941_v55 = vadd.f32 %v683_v37, %v682_v7  ;;  %v1943_v56 = vadd.f32 %v689_v38, %v688_v19 }
 0x2c2   :  { %v721_v41 = vrot.slane %v665_v34, 4  ;;  %v666_v42 = vmul.f32 %v1529_v18, %v610_v35  ;;  %v611_v52 = vmax.f32 %v587_v43, 0.0  ;;  %v589_v53 = vadd.f32 %v588_v30, %v1918_v25 }
 0x2c3   :  { %v592_v40 = vpop.f32.mrf.mxu0  ;;  %v716_v50 = vadd.f32 %v715_v32, %v664_v21  ;;  %v710_v57 = vadd.f32 %v709_v39, %v663_v20  ;;  %v1945_v63 = vadd.f32 %v695_v45, %v694_v27  ;;  %v705_v0 = vrot.slane %v704_v47, 2 }
 0x2c4   :  { %v727_v51 = vrot.slane %v666_v42, 4  ;;  %v722_v59 = vadd.f32 %v721_v41, %v665_v34  ;;  %v667_v61 = vmul.f32 %v1530_v33, %v611_v52  ;;  %v612_v62 = vmax.f32 %v589_v53, 0.0 }
 0x2c5   :  { %v594_v49 = vpop.f32.mrf.mxu0  ;;  %v593_v3 = vadd.f32 %v592_v40, %v1916_v24  ;;  %v701_v6 = vrot.slane %v1936_v46, 1  ;;  %v717_v8 = vrot.slane %v716_v50, 2  ;;  %v711_v12 = vrot.slane %v710_v57, 2 }
 0x2c6   :  { %v728_v60 = vadd.f32 %v727_v51, %v666_v42  ;;  %v595_v5 = vadd.f32 %v594_v49, %v1918_v25  ;;  %v733_v9 = vrot.slane %v667_v61, 4  ;;  %v668_v10 = vmul.f32 %v1530_v33, %v612_v62 }
 0x2c7   :  { %v596_v58 = vpop.f32.mrf.mxu0  ;;  %v613_v13 = vmax.f32 %v593_v3, 0.0  ;;  %v723_v4 = vrot.slane %v722_v59, 2  ;;  %v706_v21 = vadd.f32 %v705_v0, %v704_v47  ;;  %v718_v22 = vadd.f32 %v717_v8, %v716_v50 }
 0x2c8   :  { %v614_v2 = vmax.f32 %v595_v5, 0.0  ;;  %v597_v14 = vadd.f32 %v596_v58, %v1916_v24  ;;  %v729_v15 = vrot.slane %v728_v60, 2  ;;  %v734_v16 = vadd.f32 %v733_v9, %v667_v61 }
 0x2c9   :  { %v598_v1 = vpop.f32.mrf.mxu0  ;;  %v739_v17 = vrot.slane %v668_v10, 4  ;;  %v669_v18 = vmul.f32 %v1534_v44, %v613_v13  ;;  %v712_v24 = vadd.f32 %v711_v12, %v710_v57  ;;  %v724_v31 = vadd.f32 %v723_v4, %v722_v59 }
 0x2ca   :  { %v670_v7 = vmul.f32 %v1534_v44, %v614_v2  ;;  %v615_v19 = vmax.f32 %v597_v14, 0.0  ;;  %v599_v20 = vadd.f32 %v598_v1, %v1918_v25  ;;  %v735_v23 = vrot.slane %v734_v16, 2 }
 0x2cb   :  { %v740_v26 = vadd.f32 %v739_v17, %v668_v10  ;;  %v745_v27 = vrot.slane %v669_v18, 4  ;;  %v730_v32 = vadd.f32 %v729_v15, %v728_v60  ;;  %v707_v25 = vrot.slane %v706_v21, 1 }
 0x2cc   :  { %v751_v28 = vrot.slane %v670_v7, 4  ;;  %v671_v29 = vmul.f32 %v1535_v48, %v615_v19  ;;  %v616_v30 = vmax.f32 %v599_v20, 0.0  ;;  %v719_v39 = vrot.slane %v718_v22, 1 }
 0x2cd   :  { %v741_v33 = vrot.slane %v740_v26, 2  ;;  %v746_v34 = vadd.f32 %v745_v27, %v669_v18  ;;  %v736_v40 = vadd.f32 %v735_v23, %v734_v16  ;;  %v713_v47 = vrot.slane %v712_v24, 1  ;;  %v921_v27 = vld [vmem:[#allocation8 + $0x18] sm:$0xff] }
 0x2ce   :  { %v752_v35 = vadd.f32 %v751_v28, %v670_v7  ;;  %v757_v37 = vrot.slane %v671_v29, 4  ;;  %v672_v38 = vmul.f32 %v1535_v48, %v616_v30  ;;  %v725_v49 = vrot.slane %v724_v31, 1  ;;  %1418 = vmatpush3.msra.mxu0 %v921_v27  ;;  %v920_v28 = vld [vmem:[#allocation8 + $0x10] sm:$0xff]  ;;  %v918_v30 = vld [vmem:[#allocation8] sm:$0xff] }
 0x2cf   :  { %v742_v41 = vadd.f32 %v741_v33, %v740_v26  ;;  %v747_v42 = vrot.slane %v746_v34, 2  ;;  %v731_v50 = vrot.slane %v730_v32, 1  ;;  %v702_v48 = vadd.f32 %v701_v6, %v1936_v46  ;;  %1419 = vmatprep.subr.mxu0 %v1738_v11  ;;  %v1024_v33 = vld [vmem:[#allocation10 + $0x60] sm:$0xff] }
 0x2d0   :  { %v753_v43 = vrot.slane %v752_v35, 2  ;;  %v758_v44 = vadd.f32 %v757_v37, %v671_v29  ;;  %v763_v45 = vrot.slane %v672_v38, 4  ;;  %v708_v59 = vadd.f32 %v707_v25, %v706_v21  ;;  %v919_v29 = vld [vmem:[#allocation8 + $0x8] sm:$0xff]  ;;  %1420 = vmatpush3.msra.mxu0 %v920_v28  ;;  %v1019_v25 = vld [vmem:[#allocation10 + $0x38] sm:$0xff] }
 0x2d1   :  { %v743_v51 = vrot.slane %v742_v41, 1  ;;  %v748_v52 = vadd.f32 %v747_v42, %v746_v34  ;;  %v720_v60 = vadd.f32 %v719_v39, %v718_v22  ;;  %v737_v61 = vrot.slane %v736_v40, 1  ;;  %1421 = vmatprep.subr.mxu0 %v1738_v11  ;;  %v1023_v34 = vld [vmem:[#allocation10 + $0x58] sm:$0xff]  ;;  %v1021_v37 = vld [vmem:[#allocation10 + $0x48] sm:$0xff]  ;;  %v1018_v39 = vld [vmem:[#allocation10 + $0x30] sm:$0xff] }
 0x2d2   :  { %v754_v53 = vadd.f32 %v753_v43, %v752_v35  ;;  %v759_v57 = vrot.slane %v758_v44, 2  ;;  %v764_v58 = vadd.f32 %v763_v45, %v672_v38  ;;  %v678_v8 = vadd.f32 %v677_v54, %v1932_v36  ;;  %1422 = vmatpush3.msra.mxu0 %v919_v29  ;;  %v1022_v35 = vld [vmem:[#allocation10 + $0x50] sm:$0xff]  ;;  %v1020_v38 = vld [vmem:[#allocation10 + $0x40] sm:$0xff]  ;;  %v1015_v42 = vld [vmem:[#allocation10 + $0x18] sm:$0xff] }
 0x2d3   :  { %v749_v62 = vrot.slane %v748_v52, 1  ;;  %v838_v9 = vsel %vm824_vm2, %v1945_v63, %v1941_v55  ;;  %v714_v10 = vadd.f32 %v713_v47, %v712_v24  ;;  %v732_v1 = vadd.f32 %v731_v50, %v730_v32  ;;  %v1027_v24 = vld [vmem:[#allocation10 + $0x78] sm:$0xff]  ;;  %1423 = vmatprep.subr.mxu0 %v1738_v11  ;;  %v1025_v32 = vld [vmem:[#allocation10 + $0x68] sm:$0xff] }
 0x2d4   :  { %v755_v0 = vrot.slane %v754_v53, 1  ;;  %v760_v3 = vadd.f32 %v759_v57, %v758_v44  ;;  %v765_v5 = vrot.slane %v764_v58, 2  ;;  %v726_v12 = vadd.f32 %v725_v49, %v724_v31  ;;  %v1026_v31 = vld [vmem:[#allocation10 + $0x70] sm:$0xff]  ;;  %1424 = vmatpush3.msra.mxu0 %v918_v30  ;;  %v1252_v44 = vld [vmem:[%s2032_s8] ss:$0 sm:$0xff]  ;;  %v1121_v57 = vld [vmem:[#allocation11 + $0x78] sm:$0xff] }
 0x2d5   :  { %v744_v13 = vadd.f32 %v743_v51, %v742_v41  ;;  %v825_v2 = vsel %vm824_vm2, %v1943_v56, %v678_v8  ;;  %v738_v14 = vadd.f32 %v737_v61, %v736_v40  ;;  %v839_v15 = vsel %vm826_vm3, %v708_v59, %v838_v9  ;;  %1463 = vmatprep.subr.mxu0 %v1738_v11  ;;  %v1017_v40 = vld [vmem:[#allocation10 + $0x28] sm:$0xff]  ;;  %v1016_v41 = vld [vmem:[#allocation10 + $0x20] sm:$0xff]  ;;  %v1014_v51 = vld [vmem:[#allocation10 + $0x10] sm:$0xff] }
 0x2d6   :  { %v761_v46 = vrot.slane %v760_v3, 1  ;;  %v766_v6 = vadd.f32 %v765_v5, %v764_v58  ;;  %v756_v4 = vadd.f32 %v755_v0, %v754_v53  ;;  %v827_v16 = vsel %vm826_vm3, %v702_v48, %v825_v2  ;;  %v1012_v53 = vld [vmem:[#allocation10] sm:$0xff]  ;;  %v1120_v58 = vld [vmem:[#allocation11 + $0x70] sm:$0xff]  ;;  %v1119_v48 = vld [vmem:[#allocation11 + $0x68] sm:$0xff] }
 0x2d7   :  { %v750_v36 = vadd.f32 %v749_v62, %v748_v52  ;;  %v840_v17 = vsel %vm828_vm4, %v720_v60, %v839_v15  ;;  %v829_v18 = vsel %vm828_vm4, %v714_v10, %v827_v16  ;;  %v1013_v52 = vld [vmem:[#allocation10 + $0x8] sm:$0xff]  ;;  %v1118_v59 = vld [vmem:[#allocation11 + $0x60] sm:$0xff]  ;;  %v1117_v60 = vld [vmem:[#allocation11 + $0x58] sm:$0xff] }
 0x2d8   :  { %v767_v54 = vrot.slane %v766_v6, 1  ;;  %v762_v55 = vadd.f32 %v761_v46, %v760_v3  ;;  %v841_v63 = vsel %vm830_vm5, %v732_v1, %v840_v17  ;;  %v831_v19 = vsel %vm830_vm5, %v726_v12, %v829_v18  ;;  %v1116_v61 = vld [vmem:[#allocation11 + $0x50] sm:$0xff]  ;;  %v1115_v62 = vld [vmem:[#allocation11 + $0x48] sm:$0xff]  ;;  %v1114_v0 = vld [vmem:[#allocation11 + $0x40] sm:$0xff] }
 0x2d9   :  { %v842_v56 = vsel %vm832_vm6, %v744_v13, %v841_v63  ;;  %v833_v21 = vsel %vm832_vm6, %v738_v14, %v831_v19  ;;  %v1113_v3 = vld [vmem:[#allocation11 + $0x38] sm:$0xff]  ;;  %v1112_v5 = vld [vmem:[#allocation11 + $0x30] sm:$0xff]  ;;  %v1111_v8 = vld [vmem:[#allocation11 + $0x28] sm:$0xff] }
 0x2da   :  { %v768_v7 = vadd.f32 %v767_v54, %v766_v6  ;;  %v843_v20 = vsel %vm834_vm7, %v756_v4, %v842_v56  ;;  %v835_v23 = vsel %vm834_vm7, %v750_v36, %v833_v21  ;;  %v1110_v9 = vld [vmem:[#allocation11 + $0x20] sm:$0xff]  ;;  %v1109_v10 = vld [vmem:[#allocation11 + $0x18] sm:$0xff]  ;;  %v1108_v2 = vld [vmem:[#allocation11 + $0x10] sm:$0xff] }
 0x2db   :  { %v837_v26 = vsel %vm836_vm8, %v762_v55, %v835_v23  ;;  %v1253_v1 = vld [vmem:[%s2034_s10] ss:$0 sm:$0xff]  ;;  %v1107_v14 = vld [vmem:[#allocation11 + $0x8] sm:$0xff] }
 0x2dc   :  { %v844_v22 = vsel %vm836_vm8, %v768_v7, %v843_v20  ;;  %v1106_v4 = vld [vmem:[#allocation11] sm:$0xff] }
 0x2dd   :  { %911 = vmatprep.mubr.f32.mxu1 %v844_v22  ;;  %v1254_v15 = vld [vmem:[%s2036_s12] ss:$0 sm:$0xff] }
 0x2de   :  { %912 = vmatmul.mubr.f32.vlgmr.msra.gmra.mxu1 %v837_v26  ;;  %v1255_v55 = vld [vmem:[%s2038_s14] ss:$0 sm:$0xff] }
 0x2df   :  { %1460 = vmatprep.mubr.msk.f32.mxu1 %vm1739_vm9, %v1738_v11  ;;  %1429 = vmatpush3.msra.mxu1 %v1027_v24 }
 0x2e0   :  { %1430 = vmatprep.subr.mxu1 %v1738_v11 }
 0x2e1   :  { %1431 = vmatpush3.msra.mxu1 %v1026_v31 }
 0x2e2   :  { %1432 = vmatprep.subr.mxu1 %v1738_v11 }
 0x2e3   :  { %1433 = vmatpush3.msra.mxu1 %v1025_v32 }
 0x2e4   :  { %1434 = vmatprep.subr.mxu1 %v1738_v11 }
 0x2e5   :  { %1435 = vmatpush3.msra.mxu1 %v1024_v33 }
 0x2e6   :  { %1436 = vmatprep.subr.mxu1 %v1738_v11 }
 0x2e7   :  { %1437 = vmatpush3.msra.mxu1 %v1023_v34 }
 0x2e8   :  { %1438 = vmatprep.subr.mxu1 %v1738_v11 }
 0x2e9   :  { %1439 = vmatpush3.msra.mxu1 %v1022_v35 }
 0x2ea   :  { %1440 = vmatprep.subr.mxu1 %v1738_v11 }
 0x2eb   :  { %1441 = vmatpush3.msra.mxu1 %v1021_v37 }
 0x2ec   :  { %1442 = vmatprep.subr.mxu1 %v1738_v11 }
 0x2ed   :  { %1443 = vmatpush3.msra.mxu1 %v1020_v38 }
 0x2ee   :  { %1444 = vmatprep.subr.mxu1 %v1738_v11 }
 0x2ef   :  { %1445 = vmatpush3.msra.mxu1 %v1019_v25 }
 0x2f0   :  { %1446 = vmatprep.subr.mxu1 %v1738_v11 }
 0x2f1   :  { %1447 = vmatpush3.msra.mxu1 %v1018_v39 }
 0x2f2   :  { %1448 = vmatprep.subr.mxu1 %v1738_v11 }
 0x2f3   :  { %1449 = vmatpush3.msra.mxu1 %v1017_v40 }
 0x2f4   :  { %1450 = vmatprep.subr.mxu1 %v1738_v11 }
 0x2f5   :  { %1451 = vmatpush3.msra.mxu1 %v1016_v41 }
 0x2f6   :  { %1452 = vmatprep.subr.mxu1 %v1738_v11 }
 0x2f7   :  { %1453 = vmatpush3.msra.mxu1 %v1015_v42 }
 0x2f8   :  { %1454 = vmatprep.subr.mxu1 %v1738_v11 }
 0x2f9   :  { %1455 = vmatpush3.msra.mxu1 %v1014_v51 }
 0x2fa   :  { %1456 = vmatprep.subr.mxu1 %v1738_v11 }
 0x2fb   :  { %1457 = vmatpush3.msra.mxu1 %v1013_v52 }
 0x2fc   :  { %1458 = vmatprep.subr.mxu1 %v1738_v11 }
 0x2fd   :  { %1459 = vmatpush3.msra.mxu1 %v1012_v53 }
 0x39e   :  { %v1305_v43 = vpop.f32.mrf.mxu1 }
 0x3a0   :  { %v1306_v45 = vpop.f32.mrf.mxu1 }
 0x3a1   :  { %v1307_v47 = vadd.f32 %v1306_v45, %v1305_v43 }
 0x3a3   :  { %v914_v49 = vadd.f32 %v1307_v47, %v1252_v44 }
 0x3a5   :  { %v917_v50 = vmax.f32 %v914_v49, 0.0 }
 0x3a7   :  { %1426 = vmatmul.mubr.f32.vlgmr.msra.gmra.mxu0 %v917_v50 }
 0x3a8   :  { %1495 = vmatprep.mubr.msk.f32.mxu0 %vm1739_vm9, %v1738_v11  ;;  %1464 = vmatpush3.msra.mxu0 %v1121_v57 }
 0x3a9   :  { %1465 = vmatprep.subr.mxu0 %v1738_v11 }
 0x3aa   :  { %1466 = vmatpush3.msra.mxu0 %v1120_v58 }
 0x3ab   :  { %1467 = vmatprep.subr.mxu0 %v1738_v11 }
 0x3ac   :  { %1468 = vmatpush3.msra.mxu0 %v1119_v48 }
 0x3ad   :  { %1469 = vmatprep.subr.mxu0 %v1738_v11 }
 0x3ae   :  { %1470 = vmatpush3.msra.mxu0 %v1118_v59 }
 0x3af   :  { %1471 = vmatprep.subr.mxu0 %v1738_v11 }
 0x3b0   :  { %1472 = vmatpush3.msra.mxu0 %v1117_v60 }
 0x3b1   :  { %1473 = vmatprep.subr.mxu0 %v1738_v11 }
 0x3b2   :  { %1474 = vmatpush3.msra.mxu0 %v1116_v61 }
 0x3b3   :  { %1475 = vmatprep.subr.mxu0 %v1738_v11 }
 0x3b4   :  { %1476 = vmatpush3.msra.mxu0 %v1115_v62 }
 0x3b5   :  { %1477 = vmatprep.subr.mxu0 %v1738_v11 }
 0x3b6   :  { %1478 = vmatpush3.msra.mxu0 %v1114_v0 }
 0x3b7   :  { %1479 = vmatprep.subr.mxu0 %v1738_v11 }
 0x3b8   :  { %1480 = vmatpush3.msra.mxu0 %v1113_v3 }
 0x3b9   :  { %1481 = vmatprep.subr.mxu0 %v1738_v11 }
 0x3ba   :  { %1482 = vmatpush3.msra.mxu0 %v1112_v5 }
 0x3bb   :  { %1483 = vmatprep.subr.mxu0 %v1738_v11 }
 0x3bc   :  { %1484 = vmatpush3.msra.mxu0 %v1111_v8 }
 0x3bd   :  { %1485 = vmatprep.subr.mxu0 %v1738_v11 }
 0x3be   :  { %1486 = vmatpush3.msra.mxu0 %v1110_v9 }
 0x3bf   :  { %1487 = vmatprep.subr.mxu0 %v1738_v11 }
 0x3c0   :  { %1488 = vmatpush3.msra.mxu0 %v1109_v10 }
 0x3c1   :  { %1489 = vmatprep.subr.mxu0 %v1738_v11 }
 0x3c2   :  { %1490 = vmatpush3.msra.mxu0 %v1108_v2 }
 0x3c3   :  { %1491 = vmatprep.subr.mxu0 %v1738_v11 }
 0x3c4   :  { %1492 = vmatpush3.msra.mxu0 %v1107_v14 }
 0x3c5   :  { %1493 = vmatprep.subr.mxu0 %v1738_v11 }
 0x3c6   :  { %1494 = vmatpush3.msra.mxu0 %v1106_v4 }
 0x467   :  { %v1007_v12 = vpop.f32.mrf.mxu0 }
 0x468   :  { %v1008_v13 = vadd.f32 %v1253_v1, %v1007_v12 }
 0x469   :  { %v1427_v46 = vpop.f32.mrf.mxu0 }
 0x46a   :  { %v1011_v6 = vmax.f32 %v1008_v13, 0.0 }
 0x46c   :  { %1461 = vmatmul.mubr.f32.vlgmr.msra.gmra.mxu1 %v1011_v6 }
 0x52c   :  { %v1101_v16 = vpop.f32.mrf.mxu1 }
 0x52d   :  { %v1102_v36 = vadd.f32 %v1254_v15, %v1101_v16 }
 0x52e   :  { %v1462_v54 = vpop.f32.mrf.mxu1 }
 0x52f   :  { %v1105_v17 = vmax.f32 %v1102_v36, 0.0 }
 0x531   :  { %1496 = vmatmul.mubr.f32.vlgmr.msra.gmra.mxu0 %v1105_v17 }
 0x5f1   :  { %v1195_v63 = vpop.f32.mrf.mxu0 }
 0x5f2   :  { %v1196_v18 = vadd.f32 %v1255_v55, %v1195_v63 }
 0x5f3   :  { %v1497_v11 = vpop.f32.mrf.mxu0 }
 0x5f4   :  { %1199 = vst [vmem:[#allocation13] sm:$0xff] %v1196_v18 }
 0x5f5   :  { %1707 = shalt.err (!%p1704_p6)
}
 0x5f6   :  { %1209 = dma.vmem_to_hbm [thread:$0]  %s1207_s17, 128, %s2039_s15, [#allocation4]  }
 0x5f7   :  { %1724 = dma.done.wait [#allocation4], 128  }
 0x5f8   :  { %1725 = vsyncadd [#allocation4], 4294967168 }
 0x5f9   :  { %1213 = vsyncpa [#allocation3], 1 }
 0x5fa   :  { %1214 = vsyncpa [#allocation6], 1 }
 0x5fb   :  { %1215 = vsyncpa [#allocation9], 1 }
 0x5fc   :  { %1216 = vsyncpa [#allocation12], 1 }
 0x5fd   :  { %1217 = vsyncpa [#allocation4], 1 }

</bundles_post_ra>
